<compile_context>
chip_gen: v7x
topology: tpu7x:2x2x1
jax: 0.10.0
libtpu: 0.0.40
codegen_flags: <defaults>
</compile_context>

<pallas_src>
import functools

import jax
import jax.numpy as jnp
from jax import lax
from jax.experimental import pallas as pl
from jax.experimental.pallas import tpu as pltpu


def _round_up(a, b):
    return (a + b - 1) // b * b


def _gated_up_kernel(w_ref, p_ref, o_ref):
    # w_ref: (2*R, Kp) bf16 — fused weights for all 4 parity classes.
    #        rows [0:R]  = foreground conv half (ordered class-major, then channel)
    #        rows [R:2R] = gate conv half (same ordering)
    # p_ref: (Kp, TM)   bf16 — shared 3x3 im2col patches, lane axis = output pixels
    # o_ref: (R, TM)    bf16 — leaky_relu(x, 0.2) * sigmoid(y) for all 4 classes
    r = o_ref.shape[0]
    # One wide MXU pass for both conv halves of all 4 parity classes, f32 accumulation.
    z = jnp.dot(w_ref[...], p_ref[...], preferred_element_type=jnp.float32)   # (2R, TM)
    zx = z[:r]                                   # foreground half (R % 8 == 0 -> aligned split)
    zy = z[r:]                                   # gate half
    fg = jnp.where(zx > 0.0, zx, 0.2 * zx)       # leaky_relu(x, 0.2)          (VPU)
    # sigmoid via exp + approx reciprocal: both land on the EUP slot, VALU stays free.
    e = jnp.exp(-jnp.maximum(zy, -30.0))
    att = pl.reciprocal(1.0 + e, approx=True)
    o_ref[...] = (fg * att).astype(o_ref.dtype)  # lane-dense bf16 store (TM multiple of 128)


def _pick_tm(m, kp, r_pad):
    # Per-pixel-column VMEM bytes: 2x bf16 patch buffers (4*Kp) + 2x bf16 output buffers +
    # f32 z intermediate + gating temps (~32*R).  Budget ~40 MiB keeps the footprint safely
    # below v7x's 64 MiB/TC VMEM (and the 48 MiB vmem limit below); v5e/v6e have 128 MiB.
    per_tm = 4 * kp + 32 * r_pad
    budget = 40 * 1024 * 1024
    tm = budget // per_tm
    tm = min(tm, 4096)                    # per-step overhead already fully amortized here
    tm = max(128, (tm // 128) * 128)
    tm = min(tm, _round_up(m, 128))
    return tm


def _gated_matmul(weights, patches, r_pad, *, tm):
    # weights: (2*R_pad, Kp) bf16 ; patches: (Kp, M_pad) bf16 with M_pad % tm == 0
    two_r, kp = weights.shape
    _, m_pad = patches.shape
    grid = (m_pad // tm,)
    cost = pl.CostEstimate(
        flops=2 * two_r * kp * m_pad,
        transcendentals=r_pad * m_pad,                       # one exp per gated output element
        bytes_accessed=patches.size * 2 + weights.size * 2 + r_pad * m_pad * 2,
    )
    return pl.pallas_call(
        _gated_up_kernel,
        out_shape=jax.ShapeDtypeStruct((r_pad, m_pad), jnp.bfloat16),
        grid_spec=pltpu.PrefetchScalarGridSpec(
            num_scalar_prefetch=0,
            grid=grid,
            in_specs=[
                pl.BlockSpec((two_r, kp), lambda i: (0, 0)),   # tiny fused weights, fully resident
                pl.BlockSpec((kp, tm), lambda i: (0, i)),      # lane-dense patch loads
            ],
            out_specs=pl.BlockSpec((r_pad, tm), lambda i: (0, i)),  # lane-dense bf16 stores
        ),
        compiler_params=pltpu.CompilerParams(
            dimension_semantics=("parallel",),                 # independent pixel tiles (megacore OK)
            vmem_limit_bytes=48 * 1024 * 1024,                 # <= 56 MiB so safe on v7x (64 MiB/TC)
        ),
        cost_estimate=cost,
    )(weights, patches)


def gated_upx(x, weight, skip_input, out_size):
    """x: (N, C_in, H, W) f32, weight: (C_in, 2*out_size, 4, 4) f32 (PyTorch ConvTranspose2d
    layout), skip_input: (N, C_skip, 2H, 2W) f32 -> (N, out_size + C_skip, 2H, 2W) f32."""
    N, c_in, H, W = x.shape
    Ho, Wo = 2 * H, 2 * W
    C = out_size
    K9 = 9 * c_in
    M = N * H * W

    # Padded extents: K to the bf16 sublane quantum (16); gated-output rows (4*C) to a
    # multiple of 16 so the f32 z[:R]/z[R:] split is tile-aligned and bf16 stores unmasked.
    Kp = _round_up(K9, 16)
    R = 4 * C
    R_pad = _round_up(R, 16)

    # ---- shared 3x3 im2col over the pad-1 input (ONE patch matrix serves all 4 parity
    # classes: 9x expansion instead of the 16x of per-class 2x2 im2col). ----
    xpad = jnp.pad(x, ((0, 0), (0, 0), (1, 1), (1, 1))).astype(jnp.bfloat16)   # (N,C,H+2,W+2)
    taps = [xpad[:, :, th:th + H, tw:tw + W] for th in range(3) for tw in range(3)]
    pat = jnp.stack(taps, axis=2).reshape(N, K9, H, W)             # K ordered (c, th, tw)
    patches = pat.transpose(1, 0, 2, 3).reshape(K9, M)             # (K9, M), M ordered (n,i,j)
    # TODO(synk): remove the materialized im2col (9x HBM read expansion + XLA transpose) by
    # DMAing overlapping input row windows into VMEM and forming the 9 taps in-kernel.

    tm = _pick_tm(M, Kp, R_pad)
    m_pad = _round_up(M, tm)
    patches = jnp.pad(patches, ((0, Kp - K9), (0, m_pad - M)))

    # ---- fused weight matrix: all 4 parity classes x both conv halves ----
    # Class (ph,pw) tap (ph+dh, pw+dw) in the 3x3 window uses kernel index (3-ph-2dh, 3-pw-2dw);
    # the other 5 taps of that class are zero.  Row layout: [foreground (pc,co)] | [gate (pc,co)].
    w_bf = weight.astype(jnp.bfloat16)                              # (C_in, 2C, 4, 4)
    w_fg, w_gt = [], []
    for ph in range(2):
        for pw in range(2):
            blk = jnp.zeros((2 * C, c_in, 3, 3), dtype=jnp.bfloat16)
            for dh in range(2):
                for dw in range(2):
                    blk = blk.at[:, :, ph + dh, pw + dw].set(
                        w_bf[:, :, 3 - ph - 2 * dh, 3 - pw - 2 * dw].T)
            blk = blk.reshape(2 * C, K9)                            # K ordered (c, th, tw)
            w_fg.append(blk[:C])
            w_gt.append(blk[C:])
    w_fg = jnp.pad(jnp.concatenate(w_fg, axis=0), ((0, R_pad - R), (0, Kp - K9)))
    w_gt = jnp.pad(jnp.concatenate(w_gt, axis=0), ((0, R_pad - R), (0, Kp - K9)))
    weights = jnp.concatenate([w_fg, w_gt], axis=0)                 # (2*R_pad, Kp) bf16

    out = _gated_matmul(weights, patches, R_pad, tm=tm)             # (R_pad, m_pad) bf16
    out = out[:R, :M]
    # Pixel-shuffle the 4 parity classes back in bf16 (widen only at the final concat):
    #   y[n, c, 2i+ph, 2j+pw] = out[(2*ph+pw)*C + c, (n,i,j)]
    out = out.reshape(2, 2, C, N, H, W).transpose(3, 2, 4, 0, 5, 1)
    gated = out.reshape(N, C, Ho, Wo)
    # Channel concat with the (untouched, f32) skip connection.
    return jnp.concatenate([gated.astype(skip_input.dtype), skip_input], axis=1)


def gated_upx_reference(x, weight, skip_input, out_size):
    # ConvTranspose2d(s=2, p=1, k=4) == conv(lhs_dilation=2, pad=2, spatially-flipped kernel, I/O swapped)
    w_eq = jnp.transpose(weight, (1, 0, 2, 3))[:, :, ::-1, ::-1]    # (2*out, C_in, 4, 4) OIHW
    z = lax.conv_general_dilated(
        x, w_eq, window_strides=(1, 1), padding=((2, 2), (2, 2)),
        lhs_dilation=(2, 2), dimension_numbers=("NCHW", "OIHW", "NCHW"))
    zx, zy = z[:, :out_size], z[:, out_size:]
    gated = jnp.where(zx > 0, zx, 0.2 * zx) * jax.nn.sigmoid(zy)
    return jnp.concatenate([gated, skip_input], axis=1)


if __name__ == "__main__":
    # Small shapes consistent with the module: N=2, in_size=4, out_size=8, H=W=16
    N, in_size, out_size, H, W = 2, 4, 8, 16, 16

    key = jax.random.PRNGKey(0)
    kx, kw, ks = jax.random.split(key, 3)
    x = jax.random.normal(kx, (N, in_size, H, W), dtype=jnp.float32)
    # PyTorch ConvTranspose2d weight layout: (in_channels, 2*out_channels, kH, kW)
    fan_in = in_size * 4 * 4
    weight = jax.random.normal(kw, (in_size, 2 * out_size, 4, 4), dtype=jnp.float32) * (fan_in ** -0.5)
    skip = jax.random.normal(ks, (N, out_size, 2 * H, 2 * W), dtype=jnp.float32)

    gated_fn = jax.jit(gated_upx, static_argnums=3)
    out = gated_fn(x, weight, skip, out_size)
    out = jax.block_until_ready(out)
    assert out.shape == (N, 2 * out_size, 2 * H, 2 * W), out.shape

    # (1) Tight check of the kernel logic: reference fed the same bf16-rounded operands
    #     (tolerance covers the bf16 output store; accumulation is f32).
    xq = x.astype(jnp.bfloat16).astype(jnp.float32)
    wq = weight.astype(jnp.bfloat16).astype(jnp.float32)
    ref_q = gated_upx_reference(xq, wq, skip, out_size)
    assert jnp.allclose(out, ref_q, rtol=1e-2, atol=1e-2), float(jnp.max(jnp.abs(out - ref_q)))

    # (2) Loose check against the pure-f32 module (bf16 matmul inputs / bf16 output, f32 accumulation).
    ref = gated_upx_reference(x, weight, skip, out_size)
    assert jnp.allclose(out, ref, rtol=3e-2, atol=3e-2), float(jnp.max(jnp.abs(out - ref)))

    print("KERNEL_OK")
</pallas_src>

<mosaic_0001>
module attributes {stable_mosaic.version = 11 : i64} {
  func.func @_gated_up_kernel(%arg0: i32, %arg1: memref<64x48xbf16, #tpu.memory_space<vmem>>, %arg2: memref<48x512xbf16, #tpu.memory_space<vmem>>, %arg3: memref<32x512xbf16, #tpu.memory_space<vmem>>) attributes {dimension_semantics = [#tpu.dimension_semantics<parallel>], iteration_bounds = array<i64: 1>, scalar_prefetch = 0 : i64, scratch_operands = 0 : i64, tpu.core_type = #tpu.core_type<tc>, window_params = [{pipeline_mode = #tpu.pipeline_mode<synchronous>, transform_indices = @transform_0, window_bounds = array<i64: 64, 48>}, {transform_indices = @transform_1, window_bounds = array<i64: 48, 512>}, {transform_indices = @transform_2, window_bounds = array<i64: 32, 512>}]} {
    %c0 = arith.constant 0 : index
    %c0_0 = arith.constant 0 : index
    %0 = vector.load %arg1[%c0, %c0_0] : memref<64x48xbf16, #tpu.memory_space<vmem>>, vector<64x48xbf16>
    %c0_1 = arith.constant 0 : index
    %c0_2 = arith.constant 0 : index
    %1 = vector.load %arg2[%c0_1, %c0_2] : memref<48x512xbf16, #tpu.memory_space<vmem>>, vector<48x512xbf16>
    %cst = arith.constant dense<0.000000e+00> : vector<64x512xf32>
    %2 = tpu.matmul %0, %1, %cst {dimension_numbers = #tpu.dot_dimension_numbers<[1], [0], [0], [1], [0, 0, 1, 1], [], []>} : vector<64x48xbf16>, vector<48x512xbf16>, vector<64x512xf32> -> vector<64x512xf32>
    %3 = vector.extract_strided_slice %2 {offsets = [0, 0], sizes = [32, 512], strides = [1, 1]} : vector<64x512xf32> to vector<32x512xf32>
    %4 = vector.extract_strided_slice %2 {offsets = [32, 0], sizes = [32, 512], strides = [1, 1]} : vector<64x512xf32> to vector<32x512xf32>
    %cst_3 = arith.constant 0.000000e+00 : f32
    %5 = vector.broadcast %cst_3 : f32 to vector<32x512xf32>
    %6 = arith.cmpf ogt, %3, %5 : vector<32x512xf32>
    %cst_4 = arith.constant 2.000000e-01 : f32
    %7 = vector.broadcast %cst_4 : f32 to vector<32x512xf32>
    %8 = arith.mulf %7, %3 : vector<32x512xf32>
    %9 = arith.select %6, %3, %8 : vector<32x512xi1>, vector<32x512xf32>
    %cst_5 = arith.constant -3.000000e+01 : f32
    %10 = vector.broadcast %cst_5 : f32 to vector<32x512xf32>
    %11 = arith.maximumf %4, %10 : vector<32x512xf32>
    %cst_6 = arith.constant 0.000000e+00 : f32
    %12 = vector.broadcast %cst_6 : f32 to vector<32x512xf32>
    %13 = arith.subf %12, %11 : vector<32x512xf32>
    %14 = math.exp %13 : vector<32x512xf32>
    %cst_7 = arith.constant 1.000000e+00 : f32
    %15 = vector.broadcast %cst_7 : f32 to vector<32x512xf32>
    %16 = arith.addf %15, %14 : vector<32x512xf32>
    %17 = tpu.reciprocal %16 {approx = true} : vector<32x512xf32> -> vector<32x512xf32>
    %18 = arith.mulf %9, %17 : vector<32x512xf32>
    %19 = arith.truncf %18 : vector<32x512xf32> to vector<32x512xbf16>
    %c0_8 = arith.constant 0 : index
    %c0_9 = arith.constant 0 : index
    %20 = vector.load %arg3[%c0_8, %c0_9] : memref<32x512xbf16, #tpu.memory_space<vmem>>, vector<32x512xbf16>
    tpu.vector_store %arg3[%c0_8, %c0_9], %19 {strides = array<i32>} : memref<32x512xbf16, #tpu.memory_space<vmem>>, vector<32x512xbf16>,
    return
  }
  func.func @transform_0(%arg0: i32) -> (i32, i32) {
    %c0_i32 = arith.constant 0 : i32
    %c0_i32_0 = arith.constant 0 : i32
    %c0_i32_1 = arith.constant 0 : i32
    return %c0_i32, %c0_i32_0 : i32, i32
  }
  func.func @transform_1(%arg0: i32) -> (i32, i32) {
    %c0_i32 = arith.constant 0 : i32
    %c0_i32_0 = arith.constant 0 : i32
    return %c0_i32, %arg0 : i32, i32
  }
  func.func @transform_2(%arg0: i32) -> (i32, i32) {
    %c0_i32 = arith.constant 0 : i32
    %c0_i32_0 = arith.constant 0 : i32
    return %c0_i32, %arg0 : i32, i32
  }
}

</mosaic_0001>

<bundles_post_ra>
// kernel: gated_upx.1
= control target key start
LH: loop header
LB: loop body
LE: loop exit
PB: predicated region body
PF: predicated region fallthrough
CT: control target
= control target key end

     0   :  { %v618_v1 = vmov 0   ;;  %vm112_vm0 = vcmask 392192   ;;  %s813_s1 = inlined_call_operand.vmem [shape: bf16[48,512], index: 1, kind: input, shape index: {}]   ;;  %s814_s0 = inlined_call_operand.vmem [shape: bf16[64,48], index: 0, kind: input, shape index: {}]   ;;  %s815_s2 = inlined_call_operand.vmem [shape: bf16[32,512], index: 2, kind: output, shape index: {}]  }
   0x1   :  { %v532_v0 = vld [vmem:[%s813_s1 + $0x4] ss:$16 sps:$4 sm:$0xff]   ;;  %157 = vmatprep.mubr.bf16.mxu0 %v618_v1  ;;  %230 = vmatprep.mubr.bf16.mxu1 %v618_v1  ;;  %v534_v2 = vld [vmem:[%s813_s1 + $0xc] ss:$16 sps:$4 sm:$0xff]   ;;  %v536_v3 = vld [vmem:[%s813_s1] ss:$16 sps:$4 sm:$0xff]  }
   0x2   :  { %125 = vmatprep.subr.bf16.mxu0 %v532_v0  ;;  %v537_v4 = vld [vmem:[%s813_s1 + $0x8] ss:$16 sps:$4 sm:$0xff]   ;;  %198 = vmatprep.subr.bf16.mxu1 %v534_v2  ;;  %v538_v5 = vld [vmem:[%s813_s1 + $0x24] ss:$16 sps:$4 sm:$0xff]   ;;  %v540_v6 = vld [vmem:[%s813_s1 + $0x2c] ss:$16 sps:$4 sm:$0xff]  }
   0x3   :  { %126 = vmatpush1.bf16.msra.mxu0 %v536_v3  ;;  %199 = vmatpush1.bf16.msra.mxu1 %v537_v4  ;;  %v542_v7 = vld [vmem:[%s813_s1 + $0x20] ss:$16 sps:$4 sm:$0xff]   ;;  %v543_v8 = vld [vmem:[%s813_s1 + $0x28] ss:$16 sps:$4 sm:$0xff]   ;;  %v544_v9 = vld [vmem:[%s813_s1 + $0x44] ss:$16 sps:$4 sm:$0xff]  }
   0x4   :  { %127 = vmatprep.subr.bf16.mxu0 %v538_v5  ;;  %200 = vmatprep.subr.bf16.mxu1 %v540_v6  ;;  %v546_v10 = vld [vmem:[%s813_s1 + $0x4c] ss:$16 sps:$4 sm:$0xff]   ;;  %v548_v11 = vld [vmem:[%s813_s1 + $0x40] ss:$16 sps:$4 sm:$0xff]   ;;  %v549_v12 = vld [vmem:[%s813_s1 + $0x48] ss:$16 sps:$4 sm:$0xff]  }
   0x5   :  { %v550_v13 = vld [vmem:[%s814_s0] sm:$0xff]   ;;  %v551_v14 = vld [vmem:[%s814_s0 + $0x8] sm:$0xff]   ;;  %v552_v15 = vld [vmem:[%s814_s0 + $0x10] sm:$0xff]  }
   0x6   :  { %v553_v16 = vld [vmem:[%s814_s0 + $0x18] sm:$0xff]  }
   0x7   :  { %128 = vmatpush1.bf16.msra.mxu0 %v542_v7  ;;  %201 = vmatpush1.bf16.msra.mxu1 %v543_v8 }
   0x8   :  { %129 = vmatprep.subr.bf16.mxu0 %v544_v9  ;;  %202 = vmatprep.subr.bf16.mxu1 %v546_v10 }
   0xb   :  { %130 = vmatpush1.bf16.msra.mxu0 %v548_v11  ;;  %203 = vmatpush1.bf16.msra.mxu1 %v549_v12 }
   0xe   :  { %507 = vmatmul.mubr.msk.bf16.vlgmr.msra.gmra.mrb[0].mxu0 %vm112_vm0, %v550_v13  ;;  %511 = vmatmul.mubr.msk.bf16.vlgmr.msra.gmra.mrb[0].mxu1 %vm112_vm0, %v550_v13 }
   0xf   :  { %167 = vmatprep.mubr.bf16.mxu0 %v618_v1  ;;  %240 = vmatprep.mubr.bf16.mxu1 %v618_v1 }
  0x16   :  { %508 = vmatmul.mubr.msk.bf16.gmra.mrb[4].mxu0 %vm112_vm0, %v551_v14  ;;  %512 = vmatmul.mubr.msk.bf16.gmra.mrb[4].mxu1 %vm112_vm0, %v551_v14 }
  0x17   :  { %177 = vmatprep.mubr.bf16.mxu0 %v618_v1  ;;  %250 = vmatprep.mubr.bf16.mxu1 %v618_v1 }
  0x1e   :  { %509 = vmatmul.mubr.msk.bf16.gmra.mrb[8].mxu0 %vm112_vm0, %v552_v15  ;;  %513 = vmatmul.mubr.msk.bf16.gmra.mrb[8].mxu1 %vm112_vm0, %v552_v15 }
  0x1f   :  { %187 = vmatprep.mubr.bf16.mxu0 %v618_v1  ;;  %260 = vmatprep.mubr.bf16.mxu1 %v618_v1 }
  0x26   :  { %510 = vmatmul.mubr.msk.bf16.gmra.mrb[12].mxu0 %vm112_vm0, %v553_v16  ;;  %514 = vmatmul.mubr.msk.bf16.gmra.mrb[12].mxu1 %vm112_vm0, %v553_v16 }
  0xe1   :  { %v690_v17 = vpop.f32.mrb[0].mxu0  ;;  %v692_v18 = vpop.f32.mrb[0].mxu1 }
  0xe2   :  { %v694_v19 = vpop.f32.mrb[1].mxu0  ;;  %v696_v20 = vpop.f32.mrb[1].mxu1  ;;  %vm271_vm1 = vcmp.gt.f32.partialorder %v690_v17, 0.0  ;;  %vm273_vm2 = vcmp.gt.f32.partialorder %v692_v18, 0.0 }
  0xe3   :  { %v698_v21 = vpop.f32.mrb[2].mxu0  ;;  %v700_v22 = vpop.f32.mrb[2].mxu1  ;;  %vm272_vm3 = vcmp.gt.f32.partialorder %v694_v19, 0.0  ;;  %vm274_vm4 = vcmp.gt.f32.partialorder %v696_v20, 0.0 }
  0xe4   :  { %v702_v23 = vpop.f32.mrb[3].mxu0  ;;  %v704_v24 = vpop.f32.mrb[3].mxu1  ;;  %vm275_vm5 = vcmp.gt.f32.partialorder %v698_v21, 0.0  ;;  %vm277_vm6 = vcmp.gt.f32.partialorder %v700_v22, 0.0 }
  0xe5   :  { %vm276_vm7 = vcmp.gt.f32.partialorder %v702_v23, 0.0  ;;  %vm278_vm8 = vcmp.gt.f32.partialorder %v704_v24, 0.0 }
  0xe9   :  { %v706_v25 = vpop.f32.mrb[4].mxu0  ;;  %v708_v26 = vpop.f32.mrb[4].mxu1 }
  0xea   :  { %v710_v27 = vpop.f32.mrb[5].mxu0  ;;  %v712_v28 = vpop.f32.mrb[5].mxu1  ;;  %vm279_vm9 = vcmp.gt.f32.partialorder %v706_v25, 0.0  ;;  %vm281_vm10 = vcmp.gt.f32.partialorder %v708_v26, 0.0 }
  0xeb   :  { %v714_v29 = vpop.f32.mrb[6].mxu0  ;;  %v716_v30 = vpop.f32.mrb[6].mxu1  ;;  %vm280_vm11 = vcmp.gt.f32.partialorder %v710_v27, 0.0  ;;  %vm282_vm12 = vcmp.gt.f32.partialorder %v712_v28, 0.0 }
  0xec   :  { %v718_v31 = vpop.f32.mrb[7].mxu0  ;;  %v720_v32 = vpop.f32.mrb[7].mxu1  ;;  %vm283_vm13 = vcmp.gt.f32.partialorder %v714_v29, 0.0  ;;  %vm285_vm14 = vcmp.gt.f32.partialorder %v716_v30, 0.0 }
  0xed   :  { %vm284_vm15 = vcmp.gt.f32.partialorder %v718_v31, 0.0  ;;  %vm286_vm0 = vcmp.gt.f32.partialorder %v720_v32, 0.0 }
  0xf1   :  { %v179_v33 = vpop.f32.mrb[8].mxu0  ;;  %v252_v34 = vpop.f32.mrb[8].mxu1 }
  0xf2   :  { %v319_v35 = vmax.f32 %v179_v33, -30.0  ;;  %v321_v36 = vmax.f32 %v252_v34, -30.0  ;;  %v181_v37 = vpop.f32.mrb[9].mxu0  ;;  %v254_v38 = vpop.f32.mrb[9].mxu1 }
  0xf3   :  { %v320_v39 = vmax.f32 %v181_v37, -30.0  ;;  %v322_v40 = vmax.f32 %v254_v38, -30.0  ;;  %v183_v41 = vpop.f32.mrb[10].mxu0  ;;  %v256_v42 = vpop.f32.mrb[10].mxu1 }
  0xf4   :  { %v335_v43 = vsub.f32 0.0, %v319_v35  ;;  %v337_v44 = vsub.f32 0.0, %v321_v36  ;;  %v323_v45 = vmax.f32 %v183_v41, -30.0  ;;  %v325_v46 = vmax.f32 %v256_v42, -30.0  ;;  %v185_v47 = vpop.f32.mrb[11].mxu0  ;;  %v258_v48 = vpop.f32.mrb[11].mxu1 }
  0xf5   :  { %v336_v49 = vsub.f32 0.0, %v320_v39  ;;  %v338_v50 = vsub.f32 0.0, %v322_v40  ;;  %v324_v51 = vmax.f32 %v185_v47, -30.0  ;;  %v326_v52 = vmax.f32 %v258_v48, -30.0 }
  0xf6   :  { %v351_v53 = vmul.f32 1.442695, %v335_v43  ;;  %v355_v54 = vmul.f32 1.442695, %v337_v44  ;;  %v339_v55 = vsub.f32 0.0, %v323_v45  ;;  %v341_v56 = vsub.f32 0.0, %v325_v46 }
  0xf7   :  { %v353_v57 = vmul.f32 1.442695, %v336_v49  ;;  %v357_v58 = vmul.f32 1.442695, %v338_v50  ;;  %v340_v59 = vsub.f32 0.0, %v324_v51  ;;  %v342_v60 = vsub.f32 0.0, %v326_v52 }
  0xf8   :  { %554 = vpow2.f32 %v351_v53  ;;  %v359_v61 = vmul.f32 1.442695, %v339_v55  ;;  %v363_v62 = vmul.f32 1.442695, %v341_v56  ;;  %v287_v40 = vmul.f32 0.2, %v690_v17 }
  0xf9   :  { %556 = vpow2.f32 %v355_v54  ;;  %v189_v63 = vpop.f32.mrb[12].mxu0  ;;  %v262_v0 = vpop.f32.mrb[12].mxu1  ;;  %v361_v1 = vmul.f32 1.442695, %v340_v59  ;;  %v365_v6 = vmul.f32 1.442695, %v342_v60 }
  0xfa   :  { %558 = vpow2.f32 %v353_v57  ;;  %v327_v2 = vmax.f32 %v189_v63, -30.0  ;;  %v329_v3 = vmax.f32 %v262_v0, -30.0  ;;  %v191_v4 = vpop.f32.mrb[13].mxu0  ;;  %v264_v5 = vpop.f32.mrb[13].mxu1  ;;  %v289_v41 = vmul.f32 0.2, %v692_v18 }
  0xfb   :  { %560 = vpow2.f32 %v357_v58  ;;  %v328_v7 = vmax.f32 %v191_v4, -30.0  ;;  %v330_v8 = vmax.f32 %v264_v5, -30.0  ;;  %v193_v9 = vpop.f32.mrb[14].mxu0  ;;  %v266_v10 = vpop.f32.mrb[14].mxu1  ;;  %v303_v48 = vsel %vm271_vm1, %v690_v17, %v287_v40 }
  0xfc   :  { %562 = vpow2.f32 %v359_v61  ;;  %v343_v11 = vsub.f32 0.0, %v327_v2  ;;  %v345_v12 = vsub.f32 0.0, %v329_v3  ;;  %v331_v13 = vmax.f32 %v193_v9, -30.0  ;;  %v195_v14 = vpop.f32.mrb[15].mxu0  ;;  %v722_v15 = vpop.f32.mrb[15].mxu1 }
  0xfd   :  { %564 = vpow2.f32 %v363_v62  ;;  %v344_v16 = vsub.f32 0.0, %v328_v7  ;;  %v346_v33 = vsub.f32 0.0, %v330_v8  ;;  %v305_v49 = vsel %vm273_vm2, %v692_v18, %v289_v41 }
  0xfe   :  { %566 = vpow2.f32 %v361_v1  ;;  %v367_v34 = vmul.f32 1.442695, %v343_v11  ;;  %v371_v35 = vmul.f32 1.442695, %v345_v12  ;;  %v347_v36 = vsub.f32 0.0, %v331_v13 }
  0xff   :  { %568 = vpow2.f32 %v365_v6  ;;  %v369_v37 = vmul.f32 1.442695, %v344_v16  ;;  %v373_v38 = vmul.f32 1.442695, %v346_v33  ;;  %v333_v53 = vmax.f32 %v266_v10, -30.0 }
 0x100   :  { %570 = vpow2.f32 %v367_v34  ;;  %v375_v39 = vmul.f32 1.442695, %v347_v36  ;;  %v288_v55 = vmul.f32 0.2, %v694_v19  ;;  %v332_v57 = vmax.f32 %v195_v14, -30.0 }
 0x101   :  { %572 = vpow2.f32 %v371_v35  ;;  %v334_v18 = vmax.f32 %v722_v15, -30.0  ;;  %v290_v60 = vmul.f32 0.2, %v696_v20  ;;  %v291_v63 = vmul.f32 0.2, %v698_v21 }
 0x102   :  { %v555_v42 = vpop.eup %554  ;;  %574 = vpow2.f32 %v369_v37  ;;  %v349_v1 = vsub.f32 0.0, %v333_v53  ;;  %v304_v3 = vsel %vm272_vm3, %v694_v19, %v288_v55  ;;  %v348_v5 = vsub.f32 0.0, %v332_v57 }
 0x103   :  { %v557_v43 = vpop.eup %556  ;;  %v383_v44 = vadd.f32 1.0, %v555_v42  ;;  %576 = vpow2.f32 %v373_v38  ;;  %v350_v8 = vsub.f32 0.0, %v334_v18  ;;  %v306_v10 = vsel %vm274_vm4, %v696_v20, %v290_v60 }
 0x104   :  { %v559_v45 = vpop.eup %558  ;;  %v385_v46 = vadd.f32 1.0, %v557_v43  ;;  %578 = vpow2.f32 %v375_v39  ;;  %v293_v11 = vmul.f32 0.2, %v700_v22  ;;  %v292_v19 = vmul.f32 0.2, %v702_v23 }
 0x105   :  { %v561_v47 = vpop.eup %560  ;;  %580 = vrcp.f32 %v383_v44  ;;  %v384_v50 = vadd.f32 1.0, %v559_v45  ;;  %v379_v15 = vmul.f32 1.442695, %v349_v1  ;;  %v377_v34 = vmul.f32 1.442695, %v348_v5 }
 0x106   :  { %v563_v51 = vpop.eup %562  ;;  %582 = vrcp.f32 %v385_v46  ;;  %v386_v52 = vadd.f32 1.0, %v561_v47  ;;  %v307_v20 = vsel %vm275_vm5, %v698_v21, %v291_v63  ;;  %v381_v37 = vmul.f32 1.442695, %v350_v8 }
 0x107   :  { %v565_v54 = vpop.eup %564  ;;  %584 = vrcp.f32 %v384_v50  ;;  %v387_v56 = vadd.f32 1.0, %v563_v51  ;;  %v309_v39 = vsel %vm277_vm6, %v700_v22, %v293_v11  ;;  %v308_v42 = vsel %vm276_vm7, %v702_v23, %v292_v19 }
 0x108   :  { %v567_v58 = vpop.eup %566  ;;  %586 = vrcp.f32 %v386_v52  ;;  %v389_v17 = vadd.f32 1.0, %v565_v54  ;;  %v294_v43 = vmul.f32 0.2, %v704_v24  ;;  %v295_v45 = vmul.f32 0.2, %v706_v25 }
 0x109   :  { %v569_v59 = vpop.eup %568  ;;  %588 = vrcp.f32 %v387_v56  ;;  %v388_v61 = vadd.f32 1.0, %v567_v58  ;;  %v297_v22 = vmul.f32 0.2, %v708_v26  ;;  %v296_v23 = vmul.f32 0.2, %v710_v27 }
 0x10a   :  { %v571_v62 = vpop.eup %570  ;;  %590 = vrcp.f32 %v389_v17  ;;  %v390_v0 = vadd.f32 1.0, %v569_v59  ;;  %v310_v54 = vsel %vm278_vm8, %v704_v24, %v294_v43  ;;  %v298_v55 = vmul.f32 0.2, %v712_v28 }
 0x10b   :  { %v573_v2 = vpop.eup %572  ;;  %592 = vrcp.f32 %v388_v61  ;;  %v391_v4 = vadd.f32 1.0, %v571_v62  ;;  %v311_v58 = vsel %vm279_vm9, %v706_v25, %v295_v45  ;;  %v299_v17 = vmul.f32 0.2, %v714_v29 }
 0x10c   :  { %v575_v6 = vpop.eup %574  ;;  %594 = vrcp.f32 %v390_v0  ;;  %v393_v7 = vadd.f32 1.0, %v573_v2  ;;  %v313_v59 = vsel %vm281_vm10, %v708_v26, %v297_v22  ;;  %v312_v25 = vsel %vm280_vm11, %v710_v27, %v296_v23 }
 0x10d   :  { %v577_v9 = vpop.eup %576  ;;  %596 = vrcp.f32 %v391_v4  ;;  %v392_v12 = vadd.f32 1.0, %v575_v6  ;;  %v314_v2 = vsel %vm282_vm12, %v712_v28, %v298_v55  ;;  %v315_v4 = vsel %vm283_vm13, %v714_v29, %v299_v17 }
 0x10e   :  { %v579_v13 = vpop.eup %578  ;;  %598 = vrcp.f32 %v393_v7  ;;  %v394_v14 = vadd.f32 1.0, %v577_v9  ;;  %v302_v19 = vmul.f32 0.2, %v720_v32 }
 0x10f   :  { %v581_v16 = vpop.eup %580  ;;  %600 = vrcp.f32 %v392_v12  ;;  %v395_v33 = vadd.f32 1.0, %v579_v13  ;;  %v301_v12 = vmul.f32 0.2, %v716_v30  ;;  %v300_v13 = vmul.f32 0.2, %v718_v31 }
 0x110   :  { %v583_v35 = vpop.eup %582  ;;  %v415_v36 = vmul.f32 %v581_v16, %v303_v48  ;;  %602 = vrcp.f32 %v394_v14 }
 0x111   :  { %v585_v38 = vpop.eup %584  ;;  %v417_v40 = vmul.f32 %v583_v35, %v305_v49  ;;  %604 = vrcp.f32 %v395_v33  ;;  %v316_v33 = vsel %vm284_vm15, %v718_v31, %v300_v13 }
 0x112   :  { %v587_v41 = vpop.eup %586  ;;  %v416_v44 = vmul.f32 %v585_v38, %v304_v3  ;;  %606 = vpow2.f32 %v379_v15  ;;  %v317_v15 = vsel %vm285_vm14, %v716_v30, %v301_v12 }
 0x113   :  { %v589_v21 = vpop.eup %588  ;;  %v418_v46 = vmul.f32 %v587_v41, %v306_v10  ;;  %608 = vpow2.f32 %v377_v34 }
 0x114   :  { %v591_v47 = vpop.eup %590  ;;  %v523_v48 = vpack.c.bf16 %v416_v44, %v415_v36  ;;  %v419_v49 = vmul.f32 %v589_v21, %v307_v20  ;;  %610 = vpow2.f32 %v381_v37  ;;  %v318_v20 = vsel %vm286_vm0, %v720_v32, %v302_v19 }
 0x115   :  { %v593_v50 = vpop.eup %592  ;;  %v524_v51 = vpack.c.bf16 %v418_v46, %v417_v40  ;;  %v421_v52 = vmul.f32 %v591_v47, %v309_v39 }
 0x116   :  { %v595_v53 = vpop.eup %594  ;;  %479 = vst [vmem:[%s815_s2] sm:$0xff] %v523_v48  ;;  %v420_v56 = vmul.f32 %v593_v50, %v308_v42 }
 0x117   :  { %v597_v57 = vpop.eup %596  ;;  %480 = vst [vmem:[%s815_s2 + $0x8] sm:$0xff] %v524_v51  ;;  %v422_v24 = vmul.f32 %v595_v53, %v310_v54 }
 0x118   :  { %v599_v18 = vpop.eup %598  ;;  %v525_v60 = vpack.c.bf16 %v420_v56, %v419_v49  ;;  %v423_v61 = vmul.f32 %v597_v57, %v311_v58 }
 0x119   :  { %v601_v62 = vpop.eup %600  ;;  %v526_v63 = vpack.c.bf16 %v422_v24, %v421_v52  ;;  %v425_v0 = vmul.f32 %v599_v18, %v313_v59 }
 0x11a   :  { %v603_v1 = vpop.eup %602  ;;  %481 = vst [vmem:[%s815_s2 + $0x10] sm:$0xff] %v525_v60  ;;  %v424_v3 = vmul.f32 %v601_v62, %v312_v25 }
 0x11b   :  { %v605_v26 = vpop.eup %604  ;;  %482 = vst [vmem:[%s815_s2 + $0x18] sm:$0xff] %v526_v63  ;;  %v426_v5 = vmul.f32 %v603_v1, %v314_v2 }
 0x11c   :  { %v607_v6 = vpop.eup %606  ;;  %v527_v27 = vpack.c.bf16 %v424_v3, %v423_v61  ;;  %v427_v7 = vmul.f32 %v605_v26, %v315_v4 }
 0x11d   :  { %v609_v8 = vpop.eup %608  ;;  %v528_v9 = vpack.c.bf16 %v426_v5, %v425_v0  ;;  %v397_v10 = vadd.f32 1.0, %v607_v6 }
 0x11e   :  { %v611_v28 = vpop.eup %610  ;;  %483 = vst [vmem:[%s815_s2 + $0x20] sm:$0xff] %v527_v27  ;;  %v396_v11 = vadd.f32 1.0, %v609_v8 }
 0x11f   :  { %484 = vst [vmem:[%s815_s2 + $0x28] sm:$0xff] %v528_v9  ;;  %612 = vrcp.f32 %v397_v10  ;;  %v398_v29 = vadd.f32 1.0, %v611_v28 }
 0x120   :  { %614 = vrcp.f32 %v396_v11 }
 0x121   :  { %616 = vrcp.f32 %v398_v29 }
 0x129   :  { %v613_v14 = vpop.eup %612 }
 0x12a   :  { %v615_v16 = vpop.eup %614  ;;  %v429_v34 = vmul.f32 %v613_v14, %v317_v15 }
 0x12b   :  { %v617_v35 = vpop.eup %616  ;;  %v428_v36 = vmul.f32 %v615_v16, %v316_v33 }
 0x12c   :  { %v430_v37 = vmul.f32 %v617_v35, %v318_v20 }
 0x12d   :  { %v529_v38 = vpack.c.bf16 %v428_v36, %v427_v7 }
 0x12e   :  { %v530_v39 = vpack.c.bf16 %v430_v37, %v429_v34 }
 0x12f   :  { %485 = vst [vmem:[%s815_s2 + $0x30] sm:$0xff] %v529_v38 }
 0x130   :  { %486 = vst [vmem:[%s815_s2 + $0x38] sm:$0xff] %v530_v39 }

</bundles_post_ra>
